<compile_context>
chip_gen: v5e
topology: v5e:2x2
jax: 0.10.0
libtpu: 0.0.40
codegen_flags: <defaults>
</compile_context>

<pallas_src>
import functools

import numpy as np
import jax
import jax.numpy as jnp
from jax.experimental import pallas as pl
from jax.experimental.pallas import tpu as pltpu


def _fspecial_gauss_1d(size, sigma):
    """1-D Gaussian window, matches the torch reference (sums to 1)."""
    coords = np.arange(size, dtype=np.float32) - (size // 2)
    g = np.exp(-(coords ** 2) / np.float32(2.0 * sigma ** 2)).astype(np.float32)
    return (g / g.sum()).astype(np.float32)


def _conv_matrix(length, g):
    """Matrix M (length, length-win+1) s.t. (x @ M)[j] = sum_k x[j+k] * g[k]."""
    win = g.shape[0]
    out_len = length - win + 1
    m = np.zeros((length, out_len), dtype=np.float32)
    for j in range(out_len):
        m[j:j + win, j] = g
    return m


def _block_diag(block, n):
    r, c = block.shape
    m = np.zeros((n * r, n * c), dtype=block.dtype)
    for k in range(n):
        m[k * r:(k + 1) * r, k * c:(k + 1) * c] = block
    return m


def _largest_divisor_leq(n, cap):
    cap = max(1, min(cap, n))
    for d in range(cap, 0, -1):
        if n % d == 0:
            return d
    return 1


def _choose_group(NC, H, W):
    """Planes per grid step (divides NC exactly, so no padding is needed)."""
    if NC <= 1:
        return 1
    cap = max(1, 512 // (5 * H))         # target ~512 rows in the fused width matmul
    cap = min(cap, max(1, NC // 2))      # keep >= 2 grid steps (v7x: 2 TensorCores)
    per_plane_bytes = 4 * H * W
    cap = min(cap, max(1, (8 << 20) // (16 * per_plane_bytes)))   # VMEM sanity
    return _largest_divisor_leq(NC, cap)


def _ssim_kernel(x_ref, y_ref, a_ref, h_ref, o_ref, *,
                 G, H, W, Ho, Wo, C1, C2, nonnegative, fuse_h, approx_recip):
    # x_ref / y_ref: (G, H, W) planes for this grid step. Cast after the DMA.
    x = x_ref[...].astype(jnp.float32).reshape(G * H, W)
    y = y_ref[...].astype(jnp.float32).reshape(G * H, W)

    # Five blur inputs stacked along sublanes -> a single (5*G*H, W) tile.
    # (Contiguous (G*H, W) slabs: one 5-way concat, no per-plane slicing.)
    stack = jnp.concatenate([x, y, x * x, y * y, x * y], axis=0)

    mm_dtype = a_ref.dtype
    # Width pass: one matmul for all 5*G planes.
    t = jnp.dot(stack.astype(mm_dtype), a_ref[...],
                preferred_element_type=jnp.float32)            # (5*G*H, Wo)

    if fuse_h:
        # Height pass: one matmul with the block-diagonal (5*G*Ho, 5*G*H) matrix.
        filt = jnp.dot(h_ref[...], t.astype(mm_dtype),
                       preferred_element_type=jnp.float32)     # (5*G*Ho, Wo)
    else:
        # Large planes: per-(quantity, plane) height matmuls with the shared
        # (Ho, H) matrix (each matmul already has a wide Wo lane dimension).
        b = h_ref[...]
        filt = jnp.concatenate(
            [jnp.dot(b, t[f * H:(f + 1) * H].astype(mm_dtype),
                     preferred_element_type=jnp.float32)
             for f in range(5 * G)], axis=0)                   # (5*G*Ho, Wo)

    GHo = G * Ho
    mu1 = filt[0 * GHo:1 * GHo]
    mu2 = filt[1 * GHo:2 * GHo]
    sxx = filt[2 * GHo:3 * GHo]
    syy = filt[3 * GHo:4 * GHo]
    sxy = filt[4 * GHo:5 * GHo]

    mu1_sq = mu1 * mu1
    mu2_sq = mu2 * mu2
    mu1_mu2 = mu1 * mu2
    sigma1_sq = sxx - mu1_sq
    sigma2_sq = syy - mu2_sq
    sigma12 = sxy - mu1_mu2

    den_cs = sigma1_sq + sigma2_sq + C2
    den_l = mu1_sq + mu2_sq + C1
    if approx_recip:
        cs_map = (2.0 * sigma12 + C2) * pl.reciprocal(den_cs, approx=True)
        lum = (2.0 * mu1_mu2 + C1) * pl.reciprocal(den_l, approx=True)
    else:
        cs_map = (2.0 * sigma12 + C2) / den_cs
        lum = (2.0 * mu1_mu2 + C1) / den_l
    if nonnegative:   # reference applies relu elementwise to cs_map before the product
        cs_map = jnp.maximum(cs_map, 0.0)
    ssim_map = lum * cs_map

    # In-kernel reduction over the lane (Wo) axis: tiny (G*Ho, 1) writeback.
    o_ref[0] = jnp.sum(ssim_map, axis=1, keepdims=True)


def ssim_pallas(X, Y, win_size=11, win_sigma=1.5, data_range=1.0,
                K=(0.01, 0.4), nonnegative_ssim=True, size_average=True,
                bf16_matmul=False, approx_recip=True):
    """Pallas implementation of SSIM.forward (scalar if size_average else (N,))."""
    assert X.ndim == 4 and X.shape == Y.shape
    assert win_size % 2 == 1
    N, C, H, W = X.shape
    Ho, Wo = H - win_size + 1, W - win_size + 1
    assert Ho >= 1 and Wo >= 1, "spatial dims must be >= win_size"
    NC = N * C

    G = _choose_group(NC, H, W)
    steps = NC // G

    C1 = float((K[0] * data_range) ** 2)
    C2 = float((K[1] * data_range) ** 2)

    g1d = _fspecial_gauss_1d(win_size, win_sigma)
    A = _conv_matrix(W, g1d)                               # (W, Wo)  width blur
    Bm = np.ascontiguousarray(_conv_matrix(H, g1d).T)      # (Ho, H)  height blur

    # Fuse the height pass into a single block-diagonal matmul when that
    # operand stays small; otherwise loop over the 5*G plane blocks.
    fuse_h = (5 * G * Ho) * (5 * G * H) * 4 <= (2 << 20)
    hmat = _block_diag(Bm, 5 * G) if fuse_h else Bm
    # TODO(synk): for very large W/H a shift-and-add blur (11 VPU FMAs/output)
    # plus H-tiling with a (win_size-1) halo would beat the dense conv matrices.

    # bf16 operands hit the fast MXU path; kept off by default to preserve
    # f32-level agreement with the torch reference.
    mm_dtype = jnp.bfloat16 if bf16_matmul else jnp.float32
    A_dev = jnp.asarray(A, dtype=mm_dtype)
    H_dev = jnp.asarray(hmat, dtype=mm_dtype)

    x3 = X.reshape(NC, H, W)     # no dtype cast here: cast happens in-kernel
    y3 = Y.reshape(NC, H, W)

    kernel = functools.partial(
        _ssim_kernel, G=G, H=H, W=W, Ho=Ho, Wo=Wo,
        C1=C1, C2=C2, nonnegative=bool(nonnegative_ssim), fuse_h=fuse_h,
        approx_recip=bool(approx_recip))

    in_bytes = x3.dtype.itemsize
    vmem_est = (2 * 2 * G * H * W * in_bytes              # x, y (double-buffered)
                + 2 * 4 * (A.size + hmat.size)            # conv matrices
                + 4 * (5 * G * H * (W + Wo)               # stack + width result
                       + 12 * G * Ho * Wo))               # filtered maps + temps
    compiler_kwargs = dict(dimension_semantics=("parallel",))
    if vmem_est > 12 * (1 << 20):
        # TODO(synk): row-tile with a halo for very large planes instead of only
        # raising the scoped-VMEM limit (v7x has 64 MiB physical VMEM).
        compiler_kwargs["vmem_limit_bytes"] = int(min(2 * vmem_est, 64 << 20))

    # Advisory cost estimate for XLA's scheduler around the custom call.
    flops_per_step = 2 * (5 * G * H) * W * Wo
    flops_per_step += (2 * (5 * G * Ho) * (5 * G * H) * Wo if fuse_h
                       else 2 * 5 * G * Ho * H * Wo)
    flops_per_step += 16 * G * Ho * Wo
    cost = pl.CostEstimate(
        flops=int(steps * flops_per_step),
        transcendentals=int(2 * NC * Ho * Wo),
        bytes_accessed=int(2 * NC * H * W * in_bytes
                           + 4 * (A.size + hmat.size)
                           + 4 * steps * G * Ho))

    out = pl.pallas_call(
        kernel,
        out_shape=jax.ShapeDtypeStruct((steps, G * Ho, 1), jnp.float32),
        grid_spec=pltpu.PrefetchScalarGridSpec(
            num_scalar_prefetch=0,
            grid=(steps,),
            in_specs=[
                pl.BlockSpec((G, H, W), lambda i: (i, 0, 0)),
                pl.BlockSpec((G, H, W), lambda i: (i, 0, 0)),
                pl.BlockSpec(A.shape, lambda i: (0, 0)),
                pl.BlockSpec(hmat.shape, lambda i: (0, 0)),
            ],
            out_specs=pl.BlockSpec((1, G * Ho, 1), lambda i: (i, 0, 0)),
        ),
        compiler_params=pltpu.CompilerParams(**compiler_kwargs),
        cost_estimate=cost,
    )(x3, y3, A_dev, H_dev)

    # Tiny glue: per-plane sums -> per-image means -> batch mean.  Matches
    # torch: ssim_map.mean(-1).mean(-1).mean(-1), then .mean() if size_average.
    plane_sums = out.reshape(steps, G, Ho).sum(axis=-1).reshape(N, C)
    ssim_per_image = plane_sums.mean(axis=1) / float(Ho * Wo)
    if size_average:
        return ssim_per_image.mean()
    return ssim_per_image


class SSIM:
    """Mirror of the torch SSIM module (its only 'parameter' is the fixed
    Gaussian window, rebuilt here from win_size / win_sigma)."""

    def __init__(self, win_size=11, win_sigma=1.5, data_range=1.0,
                 size_average=True, channel=3, K=(0.01, 0.4),
                 nonnegative_ssim=True):
        self.win_size = win_size
        self.win_sigma = win_sigma
        self.data_range = data_range
        self.size_average = size_average
        self.channel = channel
        self.K = K
        self.nonnegative_ssim = nonnegative_ssim

    def __call__(self, X, Y):
        return ssim_pallas(X, Y, win_size=self.win_size, win_sigma=self.win_sigma,
                           data_range=self.data_range, K=self.K,
                           nonnegative_ssim=self.nonnegative_ssim,
                           size_average=self.size_average)


def _ssim_reference(X, Y, win_size=11, win_sigma=1.5, data_range=1.0,
                    K=(0.01, 0.4), nonnegative_ssim=True, size_average=True):
    """Pure-JAX reference mirroring the torch code, for the in-script self-check."""
    g = jnp.asarray(_fspecial_gauss_1d(win_size, win_sigma))
    X = X.astype(jnp.float32)
    Y = Y.astype(jnp.float32)
    H, W = X.shape[-2:]
    Ho, Wo = H - win_size + 1, W - win_size + 1

    def blur(v):
        t = sum(g[k] * v[..., :, k:k + Wo] for k in range(win_size))
        return sum(g[k] * t[..., k:k + Ho, :] for k in range(win_size))

    C1 = (K[0] * data_range) ** 2
    C2 = (K[1] * data_range) ** 2
    mu1, mu2 = blur(X), blur(Y)
    mu1_sq, mu2_sq, mu1_mu2 = mu1 * mu1, mu2 * mu2, mu1 * mu2
    sigma1_sq = blur(X * X) - mu1_sq
    sigma2_sq = blur(Y * Y) - mu2_sq
    sigma12 = blur(X * Y) - mu1_mu2
    cs_map = (2 * sigma12 + C2) / (sigma1_sq + sigma2_sq + C2)
    if nonnegative_ssim:
        cs_map = jnp.maximum(cs_map, 0.0)
    ssim_map = (2 * mu1_mu2 + C1) / (mu1_sq + mu2_sq + C1) * cs_map
    per_image = ssim_map.mean(axis=(1, 2, 3))
    return per_image.mean() if size_average else per_image


if __name__ == "__main__":
    key = jax.random.PRNGKey(0)
    k1, k2 = jax.random.split(key)
    # N=2, C=3 (module default channel=3), H=W=16 (>= win_size=11), range [0, 1].
    X = jax.random.uniform(k1, (2, 3, 16, 16), dtype=jnp.float32)
    Y = jax.random.uniform(k2, (2, 3, 16, 16), dtype=jnp.float32)

    module = SSIM(win_size=11, win_sigma=1.5, data_range=1.0,
                  size_average=True, channel=3, K=(0.01, 0.4),
                  nonnegative_ssim=True)
    out = jax.block_until_ready(module(X, Y))
    assert out.shape == () and jnp.isfinite(out)

    ref = jax.block_until_ready(_ssim_reference(X, Y))
    assert jnp.allclose(out, ref, rtol=5e-3, atol=5e-3), (out, ref)

    print("KERNEL_OK")
</pallas_src>

<mosaic_0001>
module attributes {stable_mosaic.version = 11 : i64} {
  func.func @_ssim_kernel(%arg0: i32, %arg1: memref<3x16x16xf32, #tpu.memory_space<vmem>>, %arg2: memref<3x16x16xf32, #tpu.memory_space<vmem>>, %arg3: memref<16x6xf32, #tpu.memory_space<vmem>>, %arg4: memref<90x240xf32, #tpu.memory_space<vmem>>, %arg5: memref<1x18x1xf32, #tpu.memory_space<vmem>>) attributes {dimension_semantics = [#tpu.dimension_semantics<parallel>], iteration_bounds = array<i64: 2>, scalar_prefetch = 0 : i64, scratch_operands = 0 : i64, tpu.core_type = #tpu.core_type<tc>, window_params = [{transform_indices = @transform_0, window_bounds = array<i64: 3, 16, 16>}, {transform_indices = @transform_1, window_bounds = array<i64: 3, 16, 16>}, {pipeline_mode = #tpu.pipeline_mode<synchronous>, transform_indices = @transform_2, window_bounds = array<i64: 16, 6>}, {pipeline_mode = #tpu.pipeline_mode<synchronous>, transform_indices = @transform_3, window_bounds = array<i64: 90, 240>}, {transform_indices = @transform_4, window_bounds = array<i64: 1, 18, 1>}]} {
    %c0 = arith.constant 0 : index
    %c0_0 = arith.constant 0 : index
    %c0_1 = arith.constant 0 : index
    %0 = vector.load %arg1[%c0, %c0_0, %c0_1] : memref<3x16x16xf32, #tpu.memory_space<vmem>>, vector<3x16x16xf32>
    %1 = vector.shape_cast %0 : vector<3x16x16xf32> to vector<48x16xf32>
    %c0_2 = arith.constant 0 : index
    %c0_3 = arith.constant 0 : index
    %c0_4 = arith.constant 0 : index
    %2 = vector.load %arg2[%c0_2, %c0_3, %c0_4] : memref<3x16x16xf32, #tpu.memory_space<vmem>>, vector<3x16x16xf32>
    %3 = vector.shape_cast %2 : vector<3x16x16xf32> to vector<48x16xf32>
    %4 = arith.mulf %1, %1 : vector<48x16xf32>
    %5 = arith.mulf %3, %3 : vector<48x16xf32>
    %6 = arith.mulf %1, %3 : vector<48x16xf32>
    %7 = tpu.concatenate %1, %3, %4, %5, %6 in 0 : vector<48x16xf32>, vector<48x16xf32>, vector<48x16xf32>, vector<48x16xf32>, vector<48x16xf32> -> vector<240x16xf32>
    %c0_5 = arith.constant 0 : index
    %c0_6 = arith.constant 0 : index
    %8 = vector.load %arg3[%c0_5, %c0_6] : memref<16x6xf32, #tpu.memory_space<vmem>>, vector<16x6xf32>
    %cst = arith.constant dense<0.000000e+00> : vector<240x6xf32>
    %9 = tpu.matmul %7, %8, %cst {dimension_numbers = #tpu.dot_dimension_numbers<[1], [0], [0], [1], [0, 0, 1, 1], [], []>} : vector<240x16xf32>, vector<16x6xf32>, vector<240x6xf32> -> vector<240x6xf32>
    %c0_7 = arith.constant 0 : index
    %c0_8 = arith.constant 0 : index
    %10 = vector.load %arg4[%c0_7, %c0_8] : memref<90x240xf32, #tpu.memory_space<vmem>>, vector<90x240xf32>
    %cst_9 = arith.constant dense<0.000000e+00> : vector<90x6xf32>
    %11 = tpu.matmul %10, %9, %cst_9 {dimension_numbers = #tpu.dot_dimension_numbers<[1], [0], [0], [1], [0, 0, 1, 1], [], []>} : vector<90x240xf32>, vector<240x6xf32>, vector<90x6xf32> -> vector<90x6xf32>
    %12 = vector.extract_strided_slice %11 {offsets = [0, 0], sizes = [18, 6], strides = [1, 1]} : vector<90x6xf32> to vector<18x6xf32>
    %13 = vector.extract_strided_slice %11 {offsets = [18, 0], sizes = [18, 6], strides = [1, 1]} : vector<90x6xf32> to vector<18x6xf32>
    %14 = vector.extract_strided_slice %11 {offsets = [36, 0], sizes = [18, 6], strides = [1, 1]} : vector<90x6xf32> to vector<18x6xf32>
    %15 = vector.extract_strided_slice %11 {offsets = [54, 0], sizes = [18, 6], strides = [1, 1]} : vector<90x6xf32> to vector<18x6xf32>
    %16 = vector.extract_strided_slice %11 {offsets = [72, 0], sizes = [18, 6], strides = [1, 1]} : vector<90x6xf32> to vector<18x6xf32>
    %17 = arith.mulf %12, %12 : vector<18x6xf32>
    %18 = arith.mulf %13, %13 : vector<18x6xf32>
    %19 = arith.mulf %12, %13 : vector<18x6xf32>
    %20 = arith.subf %14, %17 : vector<18x6xf32>
    %21 = arith.subf %15, %18 : vector<18x6xf32>
    %22 = arith.subf %16, %19 : vector<18x6xf32>
    %23 = arith.addf %20, %21 : vector<18x6xf32>
    %cst_10 = arith.constant 1.600000e-01 : f32
    %24 = vector.broadcast %cst_10 : f32 to vector<18x6xf32>
    %25 = arith.addf %23, %24 : vector<18x6xf32>
    %26 = arith.addf %17, %18 : vector<18x6xf32>
    %cst_11 = arith.constant 9.99999974E-5 : f32
    %27 = vector.broadcast %cst_11 : f32 to vector<18x6xf32>
    %28 = arith.addf %26, %27 : vector<18x6xf32>
    %cst_12 = arith.constant 2.000000e+00 : f32
    %29 = vector.broadcast %cst_12 : f32 to vector<18x6xf32>
    %30 = arith.mulf %29, %22 : vector<18x6xf32>
    %cst_13 = arith.constant 1.600000e-01 : f32
    %31 = vector.broadcast %cst_13 : f32 to vector<18x6xf32>
    %32 = arith.addf %30, %31 : vector<18x6xf32>
    %33 = tpu.reciprocal %25 {approx = true} : vector<18x6xf32> -> vector<18x6xf32>
    %34 = arith.mulf %32, %33 : vector<18x6xf32>
    %cst_14 = arith.constant 2.000000e+00 : f32
    %35 = vector.broadcast %cst_14 : f32 to vector<18x6xf32>
    %36 = arith.mulf %35, %19 : vector<18x6xf32>
    %cst_15 = arith.constant 9.99999974E-5 : f32
    %37 = vector.broadcast %cst_15 : f32 to vector<18x6xf32>
    %38 = arith.addf %36, %37 : vector<18x6xf32>
    %39 = tpu.reciprocal %28 {approx = true} : vector<18x6xf32> -> vector<18x6xf32>
    %40 = arith.mulf %38, %39 : vector<18x6xf32>
    %cst_16 = arith.constant 0.000000e+00 : f32
    %41 = vector.broadcast %cst_16 : f32 to vector<18x6xf32>
    %42 = arith.maximumf %34, %41 : vector<18x6xf32>
    %43 = arith.mulf %40, %42 : vector<18x6xf32>
    %cst_17 = arith.constant dense<0.000000e+00> : vector<18xf32>
    %44 = vector.multi_reduction <add>, %43, %cst_17 [1] : vector<18x6xf32> to vector<18xf32>
    %45 = vector.shape_cast %44 : vector<18xf32> to vector<18x1xf32>
    %c0_18 = arith.constant 0 : index
    %c0_19 = arith.constant 0 : index
    %c0_20 = arith.constant 0 : index
    %46 = vector.load %arg5[%c0_18, %c0_19, %c0_20] : memref<1x18x1xf32, #tpu.memory_space<vmem>>, vector<1x18x1xf32>
    %47 = vector.shape_cast %46 : vector<1x18x1xf32> to vector<18x1xf32>
    %48 = vector.shape_cast %45 : vector<18x1xf32> to vector<1x18x1xf32>
    tpu.vector_store %arg5[%c0_18, %c0_19, %c0_20], %48 {strides = array<i32>} : memref<1x18x1xf32, #tpu.memory_space<vmem>>, vector<1x18x1xf32>,
    return
  }
  func.func @transform_0(%arg0: i32) -> (i32, i32, i32) {
    %c0_i32 = arith.constant 0 : i32
    %c0_i32_0 = arith.constant 0 : i32
    %c0_i32_1 = arith.constant 0 : i32
    return %arg0, %c0_i32, %c0_i32_0 : i32, i32, i32
  }
  func.func @transform_1(%arg0: i32) -> (i32, i32, i32) {
    %c0_i32 = arith.constant 0 : i32
    %c0_i32_0 = arith.constant 0 : i32
    %c0_i32_1 = arith.constant 0 : i32
    return %arg0, %c0_i32, %c0_i32_0 : i32, i32, i32
  }
  func.func @transform_2(%arg0: i32) -> (i32, i32) {
    %c0_i32 = arith.constant 0 : i32
    %c0_i32_0 = arith.constant 0 : i32
    %c0_i32_1 = arith.constant 0 : i32
    return %c0_i32, %c0_i32_0 : i32, i32
  }
  func.func @transform_3(%arg0: i32) -> (i32, i32) {
    %c0_i32 = arith.constant 0 : i32
    %c0_i32_0 = arith.constant 0 : i32
    %c0_i32_1 = arith.constant 0 : i32
    return %c0_i32, %c0_i32_0 : i32, i32
  }
  func.func @transform_4(%arg0: i32) -> (i32, i32, i32) {
    %c0_i32 = arith.constant 0 : i32
    %c0_i32_0 = arith.constant 0 : i32
    %c0_i32_1 = arith.constant 0 : i32
    return %arg0, %c0_i32, %c0_i32_0 : i32, i32, i32
  }
}

</mosaic_0001>

<bundles_post_ra>
// kernel: tpu_custom_call.1
= control target key start
LH: loop header
LB: loop body
LE: loop exit
PB: predicated region body
PF: predicated region fallthrough
CT: control target
= control target key end

     0   :  { %9 = vsyncpa [#allocation3], 0  ;;  %s1455_s0 = inlined_call_operand.hbm [shape: f32[6,16,16], index: 0, kind: input, shape index: {}]   ;;  %s1456_s1 = inlined_call_operand.hbm [shape: f32[6,16,16], index: 1, kind: input, shape index: {}]   ;;  %s1457_s2 = inlined_call_operand.vmem [shape: f32[16,6], index: 2, kind: input, shape index: {}]   ;;  %s1458_s3 = inlined_call_operand.hbm [shape: f32[90,240], index: 3, kind: input, shape index: {}]   ;;  %s1459_s4 = inlined_call_operand.vmem [shape: f32[2,18,1], index: 4, kind: output, shape index: {}]  }
   0x1   :  { %11 = vsyncpa [#allocation3 + $0x1], 0 }
   0x2   :  { %12 = vsyncpa [#allocation5], 0 }
   0x3   :  { %14 = vsyncpa [#allocation5 + $0x1], 0  ;;  %s1218_s15 = smov 0   ;;  %s1220_s16 = smov 0  }
   0x4   :  { %s1222_s17 = smov 0   ;;  %s1224_s18 = smov 0  }
   0x5 LB: > { %s1237_s19 = sadd.s32 4294967295, %s1186_s18   ;;  %p40_p0 = scmp.ne.s32.totalorder %s1178_s16, %s1174_s15  ;;  %s1186_s18 = sphi %s1224_s18, %s1466_s18   ;;  %s1182_s17 = sphi %s1222_s17, %s1465_s17   ;;  %s1178_s16 = sphi %s1220_s16, %s1464_s16   ;;  %s1174_s15 = sphi %s1218_s15, %s1463_s15  }
   0x6   : > { %p41_p1 = scmp.eq.s32.totalorder %s1237_s19, 0  ;;  %p917_p2 = scmp.ge.s32.totalorder %s1186_s18, 1 }
   0x7   : > { %p145_p3 = scmp.lt.s32.totalorder %s1186_s18, 3  ;;  %s159_s23 = sshll.u32 %s1458_s3, 4  ;;  %s160_s23 = int_to_ptr.hbm [resolvable:$true] %s159_s23 }
   0x8   : > { %p1245_p4 = por %p41_p1, %p40_p0  ;;  %s1188_s25 = smov [#allocation6]  }
   0x9   : > { %p1252_p5 = pnand %p917_p2, %p145_p3  ;;  %s161_s26 = sshll.u32 %s1188_s25, 4  ;;  %s162_s26 = int_to_ptr.vmem [resolvable:$true] %s161_s26 }
   0xa   : > { %s1261_s27 = sadd.s32 1, %s1186_s18   ;;  %s1189_s28 = smov 256  }
   0xb   : > { %p991_p6 = pneg %p1252_p5  ;;  %s1190_s29 = smov 16  }
   0xc   : > { %s24_s30 = ssub.s32 %s1186_s18, %s1261_s27  ;;  %s27_s5 = sadd.s32 1, %s1182_s17 }
   0xd   : > { %p992_p7 = pnand %p991_p6, %p41_p1  ;;  %p25_p8 = scmp.eq.s32.totalorder %s24_s30, 0 }
   0xe   : > { %p34_p9 = scmp.ne.s32.totalorder %s1182_s17, %s1178_s16  ;;  %p35_p10 = scmp.eq.s32.totalorder %s1186_s18, 0 }
   0xf   : > { %994 = dma.hbm_to_vmem [thread:$0]  (!%p992_p7), %s160_s23, 3072, %s162_s26, [#allocation5], %s1189_s28, %s1189_s28, %s1190_s29  }
  0x10   : > { %p1003_p11 = scmp.lt.s32.totalorder %s1186_s18, 2  ;;  %p36_p12 = por %p35_p10, %p34_p9 }
  0x11   : > { %s1271_s6 = scalar_select %p25_p8, %s1182_s17, %s27_s5  }
  0x12   : > { %s175_s7 = sand.u32 1, %s1182_s17   ;;  %s975_s9 = smul.u32 48, %s1186_s18 }
  0x13   : > { %s1274_s8 = smul.u32 48, %s175_s7  ;;  %p1277_p13 = pnand %p1003_p11, %p36_p12 }
  0x14   : > { %s185_s13 = scalar_lea.hbm %s1455_s0, %s975_s9  ;;  %s198_s22 = sand.u32 1, %s1186_s18  }
  0x15   : > { %s179_s14 = scalar_lea.vmem [#allocation2], %s1274_s8  ;;  %s186_s21 = sshll.u32 %s185_s13, 4  ;;  %s187_s21 = int_to_ptr.hbm [resolvable:$true] %s186_s21 }
  0x16   : > { %s188_s15 = sshll.u32 %s179_s14, 4  ;;  %s176_s23 = scalar_lea.sflag [#allocation3], %s175_s7  ;;  %s189_s15 = int_to_ptr.vmem [resolvable:$true] %s188_s15 }
  0x17   : > { %s1084_s25 = sshra.s32 %s187_s21, 4  ;;  %p1088_p2 = pneg %p1277_p13  ;;  %s1085_s25 = int_to_ptr.hbm [resolvable:$true] %s1084_s25 }
  0x18   : > { %s1086_s26 = scalar_lea.hbm %s1085_s25, 48  ;;  %s1091_s30 = scalar_lea.hbm %s1455_s0, 96 }
  0x19   : > { %p1087_p0 = scmp.ne.s32.totalorder %s1085_s25, %s1086_s26  ;;  %p1092_p7 = scmp.lt.s32.totalorder %s1085_s25, %s1455_s0 }
  0x1a   : > { %p1093_p8 = scmp.lt.s32.totalorder %s1091_s30, %s1086_s26 }
  0x1b   : > { %p1089_p3 = pnand %p1088_p2, %p1087_p0 }
  0x1c   : > { %p1094_p9 = por %p1093_p8, %p1092_p7 }
  0x1d   : > { %p1090_p6 = pneg %p1089_p3 }
  0x1f   : > { %p1095_p10 = pnand %p1094_p9, %p1090_p6 }
  0x21   : > { %1098 = shalt.err (!%p1095_p10)
}
  0x22   : > { %s1191_s7 = smov 128   ;;  %s1192_s12 = smov 8  }
  0x23   : > { %998 = dma.hbm_to_vmem [thread:$0]  (!%p1277_p13), %s187_s21, 768, %s189_s15, %s176_s23, %s1191_s7, %s1191_s7, %s1192_s12  }
  0x24   : > { %s208_s28 = scalar_lea.hbm %s1456_s1, %s975_s9  ;;  %s202_s29 = scalar_lea.vmem [#allocation4], %s1274_s8 }
  0x25   : > { %s211_s5 = sshll.u32 %s202_s29, 4  ;;  %s209_s25 = sshll.u32 %s208_s28, 4  ;;  %s212_s5 = int_to_ptr.vmem [resolvable:$true] %s211_s5  ;;  %s210_s25 = int_to_ptr.hbm [resolvable:$true] %s209_s25 }
  0x26   : > { %s199_s26 = scalar_lea.sflag [#allocation5], %s198_s22  ;;  %s1114_s30 = sshra.s32 %s210_s25, 4  ;;  %s1115_s30 = int_to_ptr.hbm [resolvable:$true] %s1114_s30 }
  0x27   : > { %s1116_s11 = scalar_lea.hbm %s1115_s30, 48  ;;  %s1121_s21 = scalar_lea.hbm %s1456_s1, 96 }
  0x28   : > { %p1117_p11 = scmp.ne.s32.totalorder %s1115_s30, %s1116_s11  ;;  %p1122_p3 = scmp.lt.s32.totalorder %s1115_s30, %s1456_s1 }
  0x29   : > { %p1123_p6 = scmp.lt.s32.totalorder %s1121_s21, %s1116_s11 }
  0x2a   : > { %p1119_p12 = pnand %p1117_p11, %p1088_p2 }
  0x2b   : > { %p1124_p7 = por %p1123_p6, %p1122_p3 }
  0x2c   : > { %p1120_p0 = pneg %p1119_p12 }
  0x2e   : > { %p1125_p8 = pnand %p1124_p7, %p1120_p0 }
  0x30   : > { %1128 = shalt.err (!%p1125_p8)
}
  0x31   : > { %1001 = dma.hbm_to_vmem [thread:$0]  (!%p1277_p13), %s210_s25, 768, %s212_s5, %s199_s26, %s1191_s7, %s1191_s7, %s1192_s12  }
  0x32   : > { %223 = sbr.rel (%p1252_p5) target bundleno = 688 (0x2b0), region = 36  ;;  %s225_s8 = sand.u32 (!%p1252_p5), 1, %s1178_s16  }
  0x33   : > { %s981_s22 = smul.u32 (!%p1252_p5), 48, %s225_s8  ;;  %s226_s13 = scalar_lea.sflag (!%p1252_p5), [#allocation3], %s225_s8 }
  0x35   : > { %s1321_s14 = scalar_lea.vmem (!%p1252_p5), [#allocation2], %s981_s22 }
  0x37   : > { %1161 = dma.done.wait (%p1245_p4), %s226_s13, 768  }
  0x38   : > { %1163 = vsyncadd (%p1245_p4), %s226_s13, 4294966528  ;;  %s235_s28 = sand.u32 1, %s1237_s19   ;;  %s1328_s7 = scalar_lea.vmem [#allocation4], %s981_s22 }
  0x39   : > { %s236_s10 = scalar_lea.sflag [#allocation5], %s235_s28 }
  0x3a   : > { %1165 = dma.done.wait (%p1245_p4), %s236_s10, 768  }
  0x3b   : > { %1167 = vsyncadd (%p1245_p4), %s236_s10, 4294966528 }
  0x3c   : > { %1169 = dma.done.wait (%p41_p1), [#allocation5], 3072  }
  0x3d   : > { %1171 = vsyncadd (%p41_p1), [#allocation5], 4294964224  ;;  %v313_v0 = vld [vmem:[%s1457_s2 + $0x8] sm:$0xff]  ;;  %v312_v1 = vld [vmem:[%s1457_s2] sm:$0xff]  ;;  %vm314_vm0 = vcmask 130048   ;;  %vm536_vm1 = vcmask 916480  }
  0x3e   : > { %419 = vmatpush.msra.mxu0 %v313_v0  ;;  %977 = vmatpush.msra.mxu3 %v313_v0  ;;  %v282_v2 = vld [vmem:[%s1321_s14] sm:$0xff]  ;;  %v287_v5 = vld [vmem:[%s1321_s14 + $0x28] sm:$0xff]  ;;  %v284_v10 = vld [vmem:[%s1321_s14 + $0x10] sm:$0xff]  ;;  %vm702_vm2 = vcmask 1043456   ;;  %vm687_vm3 = vcmask 1045504   ;;  %vm801_vm4 = vcmask 48128  }
  0x3f   : > { %v286_v3 = vld [vmem:[%s1321_s14 + $0x20] sm:$0xff]  ;;  %v299_v6 = vmul.f32 %v287_v5, %v287_v5  ;;  %v283_v7 = vld [vmem:[%s1321_s14 + $0x8] sm:$0xff]  ;;  %v285_v13 = vld [vmem:[%s1321_s14 + $0x18] sm:$0xff]  ;;  %v294_v26 = vmul.f32 %v282_v2, %v282_v2  ;;  %v296_v30 = vmul.f32 %v284_v10, %v284_v10  ;;  %vm808_vm5 = vcmask 41984   ;;  %p277_p1 = scmp.lt.s32.totalorder %s1237_s19, 1 }
  0x40   : > { %v298_v4 = vmul.f32 %v286_v3, %v286_v3  ;;  %420 = vmatpush.msra.mxu0 %v312_v1  ;;  %978 = vmatpush.msra.mxu3 %v312_v1  ;;  %v288_v8 = vld [vmem:[%s1328_s7] sm:$0xff]  ;;  %v289_v11 = vld [vmem:[%s1328_s7 + $0x8] sm:$0xff]  ;;  %v290_v14 = vld [vmem:[%s1328_s7 + $0x10] sm:$0xff]  ;;  %v295_v28 = vmul.f32 %v283_v7, %v283_v7  ;;  %v297_v31 = vmul.f32 %v285_v13, %v285_v13  ;;  %vm812_vm6 = vcmask 7168  }
  0x41   : > { %927 = vmatmul.msk.f32.vlgmr.msra.gmra.mxu0 %vm314_vm0, %v282_v2  ;;  %v300_v9 = vmul.f32 %v288_v8, %v288_v8  ;;  %v301_v12 = vmul.f32 %v289_v11, %v289_v11  ;;  %v302_v15 = vmul.f32 %v290_v14, %v290_v14  ;;  %v291_v16 = vld [vmem:[%s1328_s7 + $0x18] sm:$0xff]  ;;  %v292_v18 = vld [vmem:[%s1328_s7 + $0x20] sm:$0xff]  ;;  %v293_v20 = vld [vmem:[%s1328_s7 + $0x28] sm:$0xff]  ;;  %v306_v22 = vmul.f32 %v288_v8, %v282_v2  ;;  %s1468_s19 = smov (!%p277_p1, %s1237_s19), 1 }
  0x42   : > { %943 = vmatmul.msk.f32.vlgmr.msra.gmra.mxu3 %vm314_vm0, %v298_v4  ;;  %v303_v17 = vmul.f32 %v291_v16, %v291_v16  ;;  %v304_v19 = vmul.f32 %v292_v18, %v292_v18  ;;  %v305_v21 = vmul.f32 %v293_v20, %v293_v20  ;;  %v307_v23 = vmul.f32 %v289_v11, %v283_v7  ;;  %v513_v62 = vld [vmem:[#allocation6 + $0x8] sm:$0xff]  ;;  %v515_v63 = vld [vmem:[#allocation6 + $0x18] sm:$0xff]  ;;  %v512_v0 = vld [vmem:[#allocation6] sm:$0xff]  ;;  %s982_s20 = smul.u32 24, %s1468_s19 }
  0x43   : > { %v308_v24 = vmul.f32 %v290_v14, %v284_v10  ;;  %v309_v25 = vmul.f32 %v291_v16, %v285_v13  ;;  %v310_v27 = vmul.f32 %v292_v18, %v286_v3  ;;  %v311_v29 = vmul.f32 %v293_v20, %v287_v5  ;;  %v517_v1 = vld [vmem:[#allocation6 + $0x28] sm:$0xff]  ;;  %v514_v2 = vld [vmem:[#allocation6 + $0x10] sm:$0xff]  ;;  %v516_v4 = vld [vmem:[#allocation6 + $0x20] sm:$0xff] }
  0x44   : > { %s281_s30 = scalar_lea.vmem %s1459_s4, %s982_s20  ;;  %vm815_vm7 = vcmask 1024  }
  0x49   : > { %928 = vmatmul.msk.f32.gmra.mxu0 %vm314_vm0, %v283_v7  ;;  %v523_v7 = vld [vmem:[#allocation6 + $0x58] sm:$0xff] }
  0x4a   : > { %944 = vmatmul.msk.f32.gmra.mxu3 %vm314_vm0, %v299_v6  ;;  %v518_v6 = vld [vmem:[#allocation6 + $0x30] sm:$0xff] }
  0x51   : > { %929 = vmatmul.msk.f32.gmra.mxu0 %vm314_vm0, %v284_v10  ;;  %v522_v10 = vld [vmem:[#allocation6 + $0x50] sm:$0xff] }
  0x52   : > { %945 = vmatmul.msk.f32.gmra.mxu3 %vm314_vm0, %v300_v9  ;;  %v525_v9 = vld [vmem:[#allocation6 + $0x68] sm:$0xff] }
  0x59   : > { %930 = vmatmul.msk.f32.gmra.mxu0 %vm314_vm0, %v285_v13  ;;  %v529_v13 = vld [vmem:[#allocation6 + $0x88] sm:$0xff] }
  0x5a   : > { %946 = vmatmul.msk.f32.gmra.mxu3 %vm314_vm0, %v301_v12  ;;  %v524_v12 = vld [vmem:[#allocation6 + $0x60] sm:$0xff] }
  0x61   : > { %931 = vmatmul.msk.f32.gmra.mxu0 %vm314_vm0, %v286_v3  ;;  %v519_v3 = vld [vmem:[#allocation6 + $0x38] sm:$0xff] }
  0x62   : > { %947 = vmatmul.msk.f32.gmra.mxu3 %vm314_vm0, %v302_v15  ;;  %v531_v15 = vld [vmem:[#allocation6 + $0x98] sm:$0xff] }
  0x69   : > { %932 = vmatmul.msk.f32.gmra.mxu0 %vm314_vm0, %v287_v5  ;;  %v521_v5 = vld [vmem:[#allocation6 + $0x48] sm:$0xff] }
  0x6a   : > { %948 = vmatmul.msk.f32.gmra.mxu3 %vm314_vm0, %v303_v17  ;;  %v533_v17 = vld [vmem:[#allocation6 + $0xa8] sm:$0xff] }
  0x71   : > { %933 = vmatmul.msk.f32.gmra.mxu0 %vm314_vm0, %v288_v8  ;;  %v520_v8 = vld [vmem:[#allocation6 + $0x40] sm:$0xff] }
  0x72   : > { %949 = vmatmul.msk.f32.gmra.mxu3 %vm314_vm0, %v304_v19  ;;  %v535_v19 = vld [vmem:[#allocation6 + $0xb8] sm:$0x3] }
  0x79   : > { %934 = vmatmul.msk.f32.gmra.mxu0 %vm314_vm0, %v289_v11  ;;  %v527_v11 = vld [vmem:[#allocation6 + $0x78] sm:$0xff] }
  0x7a   : > { %950 = vmatmul.msk.f32.gmra.mxu3 %vm314_vm0, %v305_v21  ;;  %v534_v21 = vld [vmem:[#allocation6 + $0xb0] sm:$0x3] }
  0x81   : > { %935 = vmatmul.msk.f32.gmra.mxu0 %vm314_vm0, %v290_v14  ;;  %v526_v14 = vld [vmem:[#allocation6 + $0x70] sm:$0xff] }
  0x82   : > { %951 = vmatmul.msk.f32.gmra.mxu3 %vm314_vm0, %v306_v22 }
  0x89   : > { %936 = vmatmul.msk.f32.gmra.mxu0 %vm314_vm0, %v291_v16  ;;  %v528_v16 = vld [vmem:[#allocation6 + $0x80] sm:$0xff] }
  0x8a   : > { %952 = vmatmul.msk.f32.gmra.mxu3 %vm314_vm0, %v307_v23 }
  0x91   : > { %937 = vmatmul.msk.f32.gmra.mxu0 %vm314_vm0, %v292_v18  ;;  %v530_v18 = vld [vmem:[#allocation6 + $0x90] sm:$0xff] }
  0x92   : > { %953 = vmatmul.msk.f32.gmra.mxu3 %vm314_vm0, %v308_v24 }
  0x99   : > { %938 = vmatmul.msk.f32.gmra.mxu0 %vm314_vm0, %v293_v20  ;;  %v532_v20 = vld [vmem:[#allocation6 + $0xa0] sm:$0xff] }
  0x9a   : > { %954 = vmatmul.msk.f32.gmra.mxu3 %vm314_vm0, %v309_v25 }
  0xa1   : > { %939 = vmatmul.msk.f32.gmra.mxu0 %vm314_vm0, %v294_v26 }
  0xa2   : > { %955 = vmatmul.msk.f32.gmra.mxu3 %vm314_vm0, %v310_v27 }
  0xa9   : > { %940 = vmatmul.msk.f32.gmra.mxu0 %vm314_vm0, %v295_v28 }
  0xaa   : > { %956 = vmatmul.msk.f32.gmra.mxu3 %vm314_vm0, %v311_v29 }
  0xb1   : > { %941 = vmatmul.msk.f32.gmra.mxu0 %vm314_vm0, %v296_v30 }
  0xb9   : > { %942 = vmatmul.msk.f32.gmra.mxu0 %vm314_vm0, %v297_v31 }
  0xbe   : > { %v1386_v32 = vpop.f32.mrf.mxu0 }
  0xc5   : > { %v470_v33 = vpop.f32.mrf.mxu3 }
  0xc6   : > { %v425_v34 = vpop.f32.mrf.mxu0 }
  0xcd   : > { %v473_v35 = vpop.f32.mrf.mxu3 }
  0xce   : > { %v428_v36 = vpop.f32.mrf.mxu0 }
  0xd5   : > { %v476_v37 = vpop.f32.mrf.mxu3 }
  0xd6   : > { %v431_v38 = vpop.f32.mrf.mxu0 }
  0xdd   : > { %v479_v39 = vpop.f32.mrf.mxu3 }
  0xde   : > { %v434_v40 = vpop.f32.mrf.mxu0 }
  0xe5   : > { %v482_v41 = vpop.f32.mrf.mxu3 }
  0xe6   : > { %v437_v42 = vpop.f32.mrf.mxu0 }
  0xed   : > { %v485_v43 = vpop.f32.mrf.mxu3 }
  0xee   : > { %v440_v44 = vpop.f32.mrf.mxu0 }
  0xf5   : > { %v488_v45 = vpop.f32.mrf.mxu3 }
  0xf6   : > { %v443_v46 = vpop.f32.mrf.mxu0 }
  0xfd   : > { %v491_v47 = vpop.f32.mrf.mxu3 }
  0xfe   : > { %v446_v48 = vpop.f32.mrf.mxu0 }
 0x105   : > { %v494_v49 = vpop.f32.mrf.mxu3 }
 0x106   : > { %v449_v50 = vpop.f32.mrf.mxu0 }
 0x10d   : > { %v497_v51 = vpop.f32.mrf.mxu3 }
 0x10e   : > { %v452_v52 = vpop.f32.mrf.mxu0 }
 0x115   : > { %v500_v53 = vpop.f32.mrf.mxu3 }
 0x116   : > { %v455_v54 = vpop.f32.mrf.mxu0 }
 0x11d   : > { %v503_v55 = vpop.f32.mrf.mxu3 }
 0x11e   : > { %v458_v56 = vpop.f32.mrf.mxu0 }
 0x125   : > { %v506_v57 = vpop.f32.mrf.mxu3 }
 0x126   : > { %v461_v58 = vpop.f32.mrf.mxu0 }
 0x12d   : > { %v509_v59 = vpop.f32.mrf.mxu3 }
 0x12e   : > { %628 = vmatpush.msra.mxu2 %v509_v59  ;;  %v464_v60 = vpop.f32.mrf.mxu0 }
 0x130   : > { %629 = vmatpush.msra.mxu2 %v506_v57 }
 0x132   : > { %630 = vmatpush.msra.mxu2 %v503_v55 }
 0x134   : > { %631 = vmatpush.msra.mxu2 %v500_v53 }
 0x136   : > { %632 = vmatpush.msra.mxu2 %v497_v51  ;;  %v467_v61 = vpop.f32.mrf.mxu0 }
 0x137   : > { %573 = vmatpush.msra.mxu1 %v467_v61 }
 0x138   : > { %633 = vmatpush.msra.mxu2 %v494_v49 }
 0x139   : > { %574 = vmatpush.msra.mxu1 %v464_v60 }
 0x13a   : > { %634 = vmatpush.msra.mxu2 %v491_v47 }
 0x13b   : > { %575 = vmatpush.msra.mxu1 %v461_v58 }
 0x13c   : > { %635 = vmatpush.msra.mxu2 %v488_v45 }
 0x13d   : > { %576 = vmatpush.msra.mxu1 %v458_v56 }
 0x13e   : > { %636 = vmatpush.msra.mxu2 %v485_v43 }
 0x13f   : > { %577 = vmatpush.msra.mxu1 %v455_v54 }
 0x140   : > { %637 = vmatpush.msra.mxu2 %v482_v41 }
 0x141   : > { %578 = vmatpush.msra.mxu1 %v452_v52 }
 0x142   : > { %638 = vmatpush.msra.mxu2 %v479_v39 }
 0x143   : > { %579 = vmatpush.msra.mxu1 %v449_v50 }
 0x144   : > { %639 = vmatpush.msra.mxu2 %v476_v37 }
 0x145   : > { %580 = vmatpush.msra.mxu1 %v446_v48 }
 0x146   : > { %640 = vmatpush.msra.mxu2 %v473_v35 }
 0x147   : > { %581 = vmatpush.msra.mxu1 %v443_v46 }
 0x148   : > { %641 = vmatpush.msra.mxu2 %v470_v33 }
 0x149   : > { %957 = vmatmul.msk.f32.vlgmr.msra.gmra.mxu2 %vm536_vm1, %v513_v62  ;;  %582 = vmatpush.msra.mxu1 %v440_v44 }
 0x14b   : > { %583 = vmatpush.msra.mxu1 %v437_v42 }
 0x14d   : > { %584 = vmatpush.msra.mxu1 %v434_v40 }
 0x14f   : > { %585 = vmatpush.msra.mxu1 %v431_v38 }
 0x151   : > { %958 = vmatmul.msk.f32.gmra.mxu2 %vm536_vm1, %v515_v63  ;;  %586 = vmatpush.msra.mxu1 %v428_v36 }
 0x153   : > { %587 = vmatpush.msra.mxu1 %v425_v34 }
 0x155   : > { %588 = vmatpush.msra.mxu1 %v1386_v32 }
 0x156   : > { %589 = vmatmul.f32.vlgmr.msra.gmra.mxu1 %v512_v0 }
 0x159   : > { %959 = vmatmul.msk.f32.gmra.mxu2 %vm536_vm1, %v517_v1 }
 0x15e   : > { %592 = vmatmul.f32.gmra.mxu1 %v514_v2 }
 0x161   : > { %960 = vmatmul.msk.f32.gmra.mxu2 %vm536_vm1, %v519_v3 }
 0x166   : > { %595 = vmatmul.f32.gmra.mxu1 %v516_v4 }
 0x169   : > { %961 = vmatmul.msk.f32.gmra.mxu2 %vm536_vm1, %v521_v5 }
 0x16e   : > { %598 = vmatmul.f32.gmra.mxu1 %v518_v6 }
 0x171   : > { %962 = vmatmul.msk.f32.gmra.mxu2 %vm536_vm1, %v523_v7 }
 0x176   : > { %601 = vmatmul.f32.gmra.mxu1 %v520_v8 }
 0x179   : > { %963 = vmatmul.msk.f32.gmra.mxu2 %vm536_vm1, %v525_v9 }
 0x17e   : > { %604 = vmatmul.f32.gmra.mxu1 %v522_v10 }
 0x181   : > { %964 = vmatmul.msk.f32.gmra.mxu2 %vm536_vm1, %v527_v11 }
 0x186   : > { %607 = vmatmul.f32.gmra.mxu1 %v524_v12 }
 0x189   : > { %965 = vmatmul.msk.f32.gmra.mxu2 %vm536_vm1, %v529_v13 }
 0x18e   : > { %610 = vmatmul.f32.gmra.mxu1 %v526_v14 }
 0x191   : > { %966 = vmatmul.msk.f32.gmra.mxu2 %vm536_vm1, %v531_v15 }
 0x196   : > { %613 = vmatmul.f32.gmra.mxu1 %v528_v16 }
 0x199   : > { %967 = vmatmul.msk.f32.gmra.mxu2 %vm536_vm1, %v533_v17 }
 0x19e   : > { %616 = vmatmul.f32.gmra.mxu1 %v530_v18 }
 0x1a1   : > { %968 = vmatmul.msk.f32.gmra.mxu2 %vm536_vm1, %v535_v19 }
 0x1a6   : > { %619 = vmatmul.f32.gmra.mxu1 %v532_v20 }
 0x1ae   : > { %622 = vmatmul.f32.gmra.mxu1 %v534_v21 }
 0x1cc   : > { %v643_v22 = vpop.f32.mrf.mxu2 }
 0x1d3   : > { %v590_v23 = vpop.f32.mrf.mxu1 }
 0x1d4   : > { %v646_v24 = vpop.f32.mrf.mxu2  ;;  %v644_v42 = vadd.f32 %v643_v22, %v590_v23 }
 0x1d6   : > { %v679_v51 = vmul.f32 %v644_v42, %v644_v42 }
 0x1d8   : > { %v703_v58 = vrot.slane %v679_v51, 4 }
 0x1db   : > { %v593_v25 = vpop.f32.mrf.mxu1 }
 0x1dc   : > { %v649_v26 = vpop.f32.mrf.mxu2  ;;  %v647_v48 = vadd.f32 %v646_v24, %v593_v25 }
 0x1de   : > { %v680_v55 = vmul.f32 %v647_v48, %v647_v48 }
 0x1e0   : > { %v704_v0 = vrot.slane %v680_v55, 4 }
 0x1e2   : > { %v705_v12 = vsel %vm702_vm2, %v703_v58, %v704_v0 }
 0x1e3   : > { %v596_v27 = vpop.f32.mrf.mxu1 }
 0x1e4   : > { %v652_v28 = vpop.f32.mrf.mxu2  ;;  %v1403_v36 = vadd.f32 %v649_v26, %v596_v27 }
 0x1e6   : > { %v1409_v40 = vmul.f32 %v1403_v36, %v1403_v36  ;;  %v688_v9 = vrot.slane %v1403_v36, 2 }
 0x1e8   : > { %v706_v45 = vrot.slane %v1409_v40, 4  ;;  %v746_v1 = vrot.slane %v1409_v40, 2 }
 0x1ea   : > { %v707_v11 = vsel %vm702_vm2, %v704_v0, %v706_v45 }
 0x1eb   : > { %v599_v29 = vpop.f32.mrf.mxu1 }
 0x1ec   : > { %v655_v30 = vpop.f32.mrf.mxu2  ;;  %v1401_v35 = vadd.f32 %v652_v28, %v599_v29 }
 0x1ee   : > { %v682_v39 = vmul.f32 %v1401_v35, %v1401_v35  ;;  %v689_v3 = vrot.slane %v1401_v35, 2 }
 0x1f0   : > { %v716_v43 = vrot.slane %v682_v39, 4  ;;  %v747_v61 = vrot.slane %v682_v39, 2  ;;  %v690_v18 = vsel %vm687_vm3, %v688_v9, %v689_v3 }
 0x1f1   : > { %v696_v26 = vmul.f32 %v690_v18, %v644_v42 }
 0x1f2   : > { %v717_v53 = vsel %vm702_vm2, %v706_v45, %v716_v43  ;;  %v748_v10 = vsel %vm687_vm3, %v746_v1, %v747_v61 }
 0x1f3   : > { %v602_v31 = vpop.f32.mrf.mxu1  ;;  %v754_v19 = vadd.f32 %v748_v10, %v679_v51 }
 0x1f4   : > { %v658_v32 = vpop.f32.mrf.mxu2  ;;  %v1411_v44 = vadd.f32 %v655_v30, %v602_v31 }
 0x1f5   : > { %v757_v30 = vadd.f32 0.0001, %v754_v19 }
 0x1f6   : > { %v683_v52 = vmul.f32 %v1411_v44, %v1411_v44  ;;  %v711_v62 = vsub.f32 %v1411_v44, %v703_v58  ;;  %v691_v27 = vrot.slane %v1411_v44, 2 }
 0x1f8   : > { %v718_v59 = vrot.slane %v683_v52, 4  ;;  %v749_v15 = vrot.slane %v683_v52, 2  ;;  %v698_v1 = vmul.f32 %v691_v27, %v1403_v36 }
 0x1fa   : > { %v719_v6 = vsel %vm702_vm2, %v716_v43, %v718_v59  ;;  %v750_v28 = vsel %vm687_vm3, %v747_v61, %v749_v15  ;;  %v785_v10 = vmul.f32 2.0, %v698_v1 }
 0x1fb   : > { %v605_v33 = vpop.f32.mrf.mxu1 }
 0x1fc   : > { %v661_v34 = vpop.f32.mrf.mxu2  ;;  %v659_v4 = vadd.f32 %v658_v32, %v605_v33  ;;  %v755_v33 = vadd.f32 %v750_v28, %v680_v55 }
 0x1fe   : > { %v712_v16 = vsub.f32 %v659_v4, %v705_v12  ;;  %v758_v43 = vadd.f32 0.0001, %v755_v33 }
 0x203   : > { %v608_v37 = vpop.f32.mrf.mxu1 }
 0x204   : > { %v664_v38 = vpop.f32.mrf.mxu2  ;;  %v662_v41 = vadd.f32 %v661_v34, %v608_v37  ;;  %v692_v34 = vsel %vm687_vm3, %v689_v3, %v691_v27 }
 0x205   : > { %v697_v42 = vmul.f32 %v692_v34, %v647_v48 }
 0x206   : > { %v723_v49 = vsub.f32 %v662_v41, %v706_v45  ;;  %v713_v13 = vsub.f32 %v662_v41, %v707_v11  ;;  %v756_v45 = vadd.f32 %v749_v15, %v1409_v40  ;;  %v788_v15 = vadd.f32 0.0001, %v785_v10 }
 0x208   : > { %v732_v56 = vrot.slane %v723_v49, 2 }
 0x20b   : > { %v611_v46 = vpop.f32.mrf.mxu1 }
 0x20c   : > { %v667_v47 = vpop.f32.mrf.mxu2  ;;  %v665_v50 = vadd.f32 %v664_v38, %v611_v46  ;;  %v783_v46 = vmul.f32 2.0, %v696_v26 }
 0x20e   : > { %v724_v54 = vsub.f32 %v665_v50, %v717_v53  ;;  %v786_v59 = vadd.f32 0.0001, %v783_v46 }
 0x210   : > { %v733_v57 = vrot.slane %v724_v54, 2 }
 0x212   : > { %v734_v60 = vsel %vm687_vm3, %v732_v56, %v733_v57  ;;  %v759_v56 = vadd.f32 0.0001, %v756_v45 }
 0x213   : > { %v614_v63 = vpop.f32.mrf.mxu1  ;;  %v740_v5 = vadd.f32 %v734_v60, %v711_v62  ;;  %v784_v60 = vmul.f32 2.0, %v697_v42 }
 0x214   : > { %v668_v2 = vadd.f32 %v667_v47, %v614_v63  ;;  %v670_v7 = vpop.f32.mrf.mxu2 }
 0x215   : > { %v743_v17 = vadd.f32 0.16, %v740_v5 }
 0x216   : > { %v725_v8 = vsub.f32 %v668_v2, %v719_v6 }
 0x217   : > { %1042 = vrcp.f32 %v743_v17 }
 0x218   : > { %v735_v14 = vrot.slane %v725_v8, 2 }
 0x21a   : > { %v736_v20 = vsel %vm687_vm3, %v733_v57, %v735_v14  ;;  %v742_v21 = vadd.f32 %v735_v14, %v713_v13 }
 0x21b   : > { %v741_v22 = vadd.f32 %v736_v20, %v712_v16  ;;  %v617_v23 = vpop.f32.mrf.mxu1 }
 0x21c   : > { %v745_v24 = vadd.f32 0.16, %v742_v21  ;;  %v671_v25 = vadd.f32 %v670_v7, %v617_v23  ;;  %v673_v32 = vpop.f32.mrf.mxu2  ;;  %v787_v7 = vadd.f32 0.0001, %v784_v60 }
 0x21d   : > { %v744_v29 = vadd.f32 0.16, %v741_v22  ;;  %v1043_v35 = vpop.eup %1042 }
 0x21e   : > { %1044 = vrcp.f32 %v745_v24  ;;  %v726_v31 = vsub.f32 %v671_v25, %v696_v26  ;;  %v772_v49 = vrot.slane %v1043_v35, 4 }
 0x21f   : > { %1046 = vrcp.f32 %v744_v29 }
 0x220   : > { %1048 = vrcp.f32 %v757_v30  ;;  %v760_v37 = vmul.f32 2.0, %v726_v31 }
 0x221   : > { %1050 = vrcp.f32 %v758_v43 }
 0x222   : > { %v763_v52 = vadd.f32 0.16, %v760_v37  ;;  %1052 = vrcp.f32 %v759_v56 }
 0x223   : > { %v620_v38 = vpop.f32.mrf.mxu1 }
 0x224   : > { %v1045_v39 = vpop.eup %1044  ;;  %v674_v41 = vadd.f32 %v673_v32, %v620_v38  ;;  %v676_v57 = vpop.f32.mrf.mxu2 }
 0x225   : > { %v1047_v44 = vpop.eup %1046  ;;  %v775_v51 = vrot.slane %v1045_v39, 4 }
 0x226   : > { %v727_v47 = vsub.f32 %v674_v41, %v697_v42  ;;  %v773_v50 = vrot.slane %v1047_v44, 4  ;;  %v1049_v53 = vpop.eup %1048 }
 0x227   : > { %v792_v62 = vmul.f32 %v1049_v53, %v786_v59  ;;  %v1051_v4 = vpop.eup %1050 }
 0x228   : > { %v761_v54 = vmul.f32 2.0, %v727_v47  ;;  %v774_v55 = vsel %vm702_vm2, %v772_v49, %v773_v50  ;;  %v776_v63 = vsel %vm702_vm2, %v773_v50, %v775_v51  ;;  %v793_v11 = vmul.f32 %v1051_v4, %v787_v7  ;;  %v1053_v13 = vpop.eup %1052 }
 0x229   : > { %v780_v58 = vmul.f32 %v774_v55, %v763_v52  ;;  %v794_v16 = vmul.f32 %v1053_v13, %v788_v15 }
 0x22a   : > { %v764_v48 = vadd.f32 0.16, %v761_v54 }
 0x22b   : > { %v623_v61 = vpop.f32.mrf.mxu1  ;;  %v795_v40 = vmax.f32 %v780_v58, 0.0 }
 0x22c   : > { %v677_v0 = vadd.f32 %v676_v57, %v623_v61  ;;  %v781_v2 = vmul.f32 %v776_v63, %v764_v48 }
 0x22d   : > { %v798_v3 = vmul.f32 %v795_v40, %v792_v62 }
 0x22e   : > { %v728_v5 = vsub.f32 %v677_v0, %v698_v1  ;;  %v796_v8 = vmax.f32 %v781_v2, 0.0 }
 0x22f   : > { %v802_v6 = vsel %vm801_vm4, %v798_v3, 0.0 }
 0x230   : > { %v762_v9 = vmul.f32 2.0, %v728_v5  ;;  %803 = vadd.xlane.f32.xlu0 %v802_v6  ;;  %v799_v14 = vmul.f32 %v796_v8, %v793_v11 }
 0x232   : > { %v765_v12 = vadd.f32 0.16, %v762_v9  ;;  %v805_v18 = vsel %vm801_vm4, %v799_v14, 0.0 }
 0x234   : > { %v782_v36 = vmul.f32 %v775_v51, %v765_v12 }
 0x236   : > { %v797_v17 = vmax.f32 %v782_v36, 0.0 }
 0x238   : > { %806 = vadd.xlane.f32.xlu0 %v805_v18  ;;  %v800_v19 = vmul.f32 %v797_v17, %v794_v16 }
 0x23a   : > { %v809_v20 = vsel %vm808_vm5, %v800_v19, 0.0 }
 0x23b   : > { %810 = vadd.xlane.f32.xlu1 %v809_v20 }
 0x2a3   : > { %v804_v21 = vpop.xlane.xlu0 %803 }
 0x2a4   : > { %813 = vst.msk [vmem:[%s281_s30] sm:$0xff] %vm812_vm6, %v804_v21 }
 0x2ab   : > { %v807_v22 = vpop.xlane.xlu0 %806 }
 0x2ac   : > { %814 = vst.msk [vmem:[%s281_s30 + $0x8] sm:$0xff] %vm812_vm6, %v807_v22 }
 0x2ae   : > { %v811_v23 = vpop.xlane.xlu1 %810 }
 0x2af   : > { %816 = vst.msk [vmem:[%s281_s30 + $0x10] sm:$0x3] %vm815_vm7, %v811_v23 }
 0x2b0 PF: > { %p17_p4 = scmp.ge.s32.totalorder %s1261_s27, 4   ;;  %s1463_s15 = smov %s1178_s16 }
 0x2b1   : > { %s1464_s16 = smov %s1182_s17  ;;  %s1465_s17 = smov %s1271_s6 }
 0x2b2   : > { %s1466_s18 = smov %s1261_s27  ;;  %19 = sbr.rel (!%p17_p4) target bundleno = 5 (0x5), region = 93 }
 0x2b7   :  { %838 = vsyncpa [#allocation3], 1 }
 0x2b8   :  { %840 = vsyncpa [#allocation3 + $0x1], 1 }
 0x2b9   :  { %841 = vsyncpa [#allocation5], 1 }
 0x2ba   :  { %843 = vsyncpa [#allocation5 + $0x1], 1 }

</bundles_post_ra>
